<compile_context>
chip_gen: v6e
topology: v6e:2x2x1
jax: 0.10.0
libtpu: 0.0.40
codegen_flags: <defaults>
</compile_context>

<pallas_src>
import math
from functools import partial

import jax
import jax.numpy as jnp
from jax.experimental import pallas as pl
from jax.experimental.pallas import tpu as pltpu


_VMEM_LIMIT_BYTES = 48 * 1024 * 1024   # under v7x's 64 MiB/TC physical VMEM
_VMEM_WORK_BUDGET = 40 * 1024 * 1024   # budget used to derive the pass-2 centroid tile


# --------------------------- pass 1a: shared MLP ---------------------------

def _mlp_kernel(feats_ref, w1_ref, s1_ref, t1_ref, w2_ref, s2_ref, t2_ref, h_ref):
    """(1x1 conv -> folded eval BN -> ReLU) x2 on one (C_in, TN) tile."""
    f32 = jnp.float32
    x = feats_ref[0]                                                   # (C_in, TN)
    h = jnp.dot(w1_ref[...], x, preferred_element_type=f32)           # (C_out, TN) f32 acc
    h = jnp.maximum(h * s1_ref[...] + t1_ref[...], 0.0)
    h = jnp.dot(w2_ref[...], h.astype(w2_ref.dtype), preferred_element_type=f32)
    h = jnp.maximum(h * s2_ref[...] + t2_ref[...], 0.0)
    h_ref[0] = h.astype(h_ref.dtype)


# --------------------- pass 1b: furthest point sampling ---------------------

def _fps_kernel(num_samples, pts_ref, idx_ref):
    """FPS (deterministic start at index 0) emitting lane-dense int32 indices (1, M)."""
    f32 = jnp.float32
    pts = pts_ref[0].astype(f32)                                       # (3, N)
    N = pts.shape[1]
    M = num_samples
    px = pts[0:1, :]
    py = pts[1:2, :]
    pz = pts[2:3, :]
    iota_n = jax.lax.broadcasted_iota(jnp.int32, (1, N), 1)
    iota_m = jax.lax.broadcasted_iota(jnp.int32, (1, M), 1)

    # TODO(synk): an SMEM-scalar gather of the newly selected point would shorten the
    # serial chain further; kept as a single masked (3,N)->(3,1) lane reduction.
    def body(i, carry):
        curp, cur_idx, dist, idx_vec = carry
        # record centroid i into the loop-carried index vector (pure VPU select)
        idx_vec = jnp.where(iota_m == i, cur_idx, idx_vec)
        # squared distance of every point to the current point (pure per-coordinate VPU)
        cx = curp[0:1, :]
        cy = curp[1:2, :]
        cz = curp[2:3, :]
        d = (px - cx) ** 2 + (py - cy) ** 2 + (pz - cz) ** 2           # (1, N)
        dist = jnp.minimum(dist, d)
        # next index = argmax of running min-distance (first occurrence on ties)
        mx = jnp.max(dist, axis=1, keepdims=True)                      # (1, 1)
        nxt = jnp.min(jnp.where(dist >= mx, iota_n, N),
                      axis=1, keepdims=True)                           # (1, 1) int32
        selb = iota_n == nxt                                           # (1, N)
        # single consolidated (3,N)->(3,1) masked reduce for the new point's coordinates
        newp = jnp.sum(jnp.where(selb, pts, 0.0), axis=1, keepdims=True)
        return newp, nxt, dist, idx_vec

    init = (pts[:, 0:1],
            jnp.zeros((1, 1), jnp.int32),
            jnp.full((1, N), 1e30, f32),
            jnp.zeros((1, M), jnp.int32))
    _, _, _, idx_vec = jax.lax.fori_loop(0, M, body, init)
    idx_ref[0] = idx_vec                                               # one lane-dense store


# --------------------- pass 2: kNN + grouped feature mean ---------------------

def _knn_group_kernel(num_neighbors, acc_dtype, pts_ref, cent_ref, h_ref, out_ref):
    """Per (batch, centroid-tile): kNN selection + grouped mean of the MLP features."""
    f32 = jnp.float32
    K = num_neighbors
    pts = pts_ref[0].astype(f32)          # (3, N)
    N = pts.shape[1]
    px = pts[0:1, :]
    py = pts[1:2, :]
    pz = pts[2:3, :]

    c = cent_ref[0].astype(f32)           # (TM, 3) centroid rows for this tile
    cx = c[:, 0:1]
    cy = c[:, 1:2]
    cz = c[:, 2:3]

    # exact squared distances, (TM, N): centroids on sublanes, points on lanes
    d = (px - cx) ** 2 + (py - cy) ** 2 + (pz - cz) ** 2
    iota_n = jax.lax.broadcasted_iota(jnp.int32, (1, N), 1)

    # top-K (smallest) per centroid as a 0/1 selection matrix; fori_loop(unroll=True)
    # bounds the (TM, N) live ranges while keeping LLO scheduling visibility.
    def body(_, carry):
        d, w = carry
        dmin = jnp.min(d, axis=1, keepdims=True)                       # (TM, 1)
        idx = jnp.min(jnp.where(d <= dmin, iota_n, N),
                      axis=1, keepdims=True)                           # (TM, 1) int32
        selb = iota_n == idx                                           # (TM, N)
        w = w + selb.astype(f32)                                       # accumulate in f32
        d = jnp.where(selb, 1e30, d)
        return d, w

    _, w = jax.lax.fori_loop(0, K, body, (d, jnp.zeros(d.shape, f32)), unroll=True)

    # grouped_feats.mean(dim=3)  ==  h @ selection^T / K   (MXU, f32 accumulation);
    # single cast of the 0/1 selection matrix to the MXU dtype.
    hm = h_ref[0].astype(acc_dtype)                                    # (C_out, N)
    out = jax.lax.dot_general(hm, w.astype(acc_dtype), (((1,), (1,)), ((), ())),
                              preferred_element_type=f32)              # (C_out, TM)
    out_ref[0] = (out * (1.0 / K)).astype(out_ref.dtype)


# ------------------------------- tiling helpers -------------------------------

def _pick_tile_n(n, cap=2048):
    """Largest lane-aligned N-tile (divisor of N) for the MLP pass."""
    if n <= cap:
        return n
    t = (cap // 128) * 128
    while t >= 128:
        if n % t == 0:
            return t
        t -= 128
    # TODO(synk): pad N to a 128-multiple instead of falling back to the full extent.
    return n


def _derive_tile_m(m, n, c_out, h_bytes, budget_bytes):
    """Centroid-tile TM (and possibly padded M) so the (TM, N) working set fits VMEM."""
    if m <= 128:
        return m, m
    fixed = 2 * c_out * n * h_bytes + 2 * 3 * n * 4 + (1 << 20)   # double-buffered h + points
    per_row = n * 12                                              # f32 d + f32 w + temporaries
    avail = max(budget_bytes - fixed, 128 * per_row)
    tm_cap = min(512, max(128, (avail // per_row) // 128 * 128))
    for t in range(tm_cap, 127, -128):
        if m % t == 0:
            return t, m
    # no lane-aligned divisor: pad M to the next 128 multiple (tail outputs discarded)
    m_pad = ((m + 127) // 128) * 128
    for t in range(tm_cap, 127, -128):
        if m_pad % t == 0:
            return t, m_pad
    return 128, m_pad


# ---------------------------------- wrapper ----------------------------------

def transition_down_block(feats, points, params, downsample_ratio, num_neighbors,
                          *, use_bf16_mxu=True):
    """feats: (B, C_in, N), points: (B, 3, N) -> ((B, C_out, M), (B, 3, M))."""
    B, C_in, N = feats.shape
    C_out = params["w1"].shape[0]
    M = int(math.ceil(N / downsample_ratio))

    # Fold eval-mode BatchNorm into per-channel scale / bias.
    # TODO(synk): training-mode BatchNorm batch statistics are not reproduced.
    eps = 1e-5
    s1v = params["gamma1"] / jnp.sqrt(params["var1"] + eps)
    t1v = params["beta1"] - params["mean1"] * s1v
    s2v = params["gamma2"] / jnp.sqrt(params["var2"] + eps)
    t2v = params["beta2"] - params["mean2"] * s2v
    s1 = s1v.reshape(C_out, 1).astype(jnp.float32)
    t1 = t1v.reshape(C_out, 1).astype(jnp.float32)
    s2 = s2v.reshape(C_out, 1).astype(jnp.float32)
    t2 = t2v.reshape(C_out, 1).astype(jnp.float32)
    w1 = params["w1"].astype(feats.dtype)
    w2 = params["w2"].astype(feats.dtype)
    h_dtype = jnp.bfloat16 if use_bf16_mxu else feats.dtype

    # -------- pass 1a: shared MLP, tiled over (B, N // TN), both axes parallel --------
    TN = _pick_tile_n(N)
    Tn = N // TN
    grid_mlp = pltpu.PrefetchScalarGridSpec(
        num_scalar_prefetch=0,
        grid=(B, Tn),
        in_specs=[
            pl.BlockSpec((1, C_in, TN), lambda b, t: (b, 0, t)),   # feats tile
            pl.BlockSpec((C_out, C_in), lambda b, t: (0, 0)),      # W1
            pl.BlockSpec((C_out, 1), lambda b, t: (0, 0)),         # BN1 scale
            pl.BlockSpec((C_out, 1), lambda b, t: (0, 0)),         # BN1 bias
            pl.BlockSpec((C_out, C_out), lambda b, t: (0, 0)),     # W2
            pl.BlockSpec((C_out, 1), lambda b, t: (0, 0)),         # BN2 scale
            pl.BlockSpec((C_out, 1), lambda b, t: (0, 0)),         # BN2 bias
        ],
        out_specs=pl.BlockSpec((1, C_out, TN), lambda b, t: (b, 0, t)),
    )
    h = pl.pallas_call(
        _mlp_kernel,
        out_shape=jax.ShapeDtypeStruct((B, C_out, N), h_dtype),
        grid_spec=grid_mlp,
        compiler_params=pltpu.CompilerParams(
            dimension_semantics=("parallel", "parallel"),
            vmem_limit_bytes=_VMEM_LIMIT_BYTES),
    )(feats, w1, s1, t1, w2, s2, t2)

    # -------- pass 1b: furthest point sampling -> lane-dense (B, 1, M) indices --------
    grid_fps = pltpu.PrefetchScalarGridSpec(
        num_scalar_prefetch=0,
        grid=(B,),
        in_specs=[pl.BlockSpec((1, 3, N), lambda b: (b, 0, 0))],
        out_specs=pl.BlockSpec((1, 1, M), lambda b: (b, 0, 0)),
    )
    fps_idx = pl.pallas_call(
        partial(_fps_kernel, M),
        out_shape=jax.ShapeDtypeStruct((B, 1, M), jnp.int32),
        grid_spec=grid_fps,
        compiler_params=pltpu.CompilerParams(
            dimension_semantics=("parallel",),
            vmem_limit_bytes=_VMEM_LIMIT_BYTES),
    )(points)

    # Gather centroid coordinates in the wrapper (tiny XLA gather, no lane-sparse stores
    # inside the serial FPS loop, and no trailing transpose of the user-facing output).
    centroids = jnp.take_along_axis(
        points, jnp.broadcast_to(fps_idx, (B, 3, M)), axis=2)          # (B, 3, M)
    cent_rows = jnp.transpose(centroids, (0, 2, 1))                    # (B, M, 3) for pass 2

    # -------- pass 2: kNN + grouped mean, VMEM-budgeted centroid tiles --------
    h_bytes = 2 if use_bf16_mxu else jnp.dtype(feats.dtype).itemsize
    TM, M_use = _derive_tile_m(M, N, C_out, h_bytes, _VMEM_WORK_BUDGET)
    if M_use > M:
        cent_rows = jnp.pad(cent_rows, ((0, 0), (0, M_use - M), (0, 0)), mode="edge")
    T = M_use // TM
    acc_dtype = jnp.bfloat16 if use_bf16_mxu else jnp.float32
    grid_knn = pltpu.PrefetchScalarGridSpec(
        num_scalar_prefetch=0,
        grid=(B, T),
        in_specs=[
            pl.BlockSpec((1, 3, N), lambda b, t: (b, 0, 0)),       # points (once / batch)
            pl.BlockSpec((1, TM, 3), lambda b, t: (b, t, 0)),      # centroid tile
            pl.BlockSpec((1, C_out, N), lambda b, t: (b, 0, 0)),   # MLP features (once / batch)
        ],
        out_specs=pl.BlockSpec((1, C_out, TM), lambda b, t: (b, 0, t)),
    )
    feats_out = pl.pallas_call(
        partial(_knn_group_kernel, num_neighbors, acc_dtype),
        out_shape=jax.ShapeDtypeStruct((B, C_out, M_use), feats.dtype),
        grid_spec=grid_knn,
        compiler_params=pltpu.CompilerParams(
            dimension_semantics=("parallel", "parallel"),
            vmem_limit_bytes=_VMEM_LIMIT_BYTES),
    )(points, cent_rows, h)
    if M_use > M:
        feats_out = feats_out[:, :, :M]

    return feats_out, centroids


# ---------------------------- pure-JAX reference ----------------------------

def _reference(feats, points, params, downsample_ratio, num_neighbors):
    eps = 1e-5
    s1 = params["gamma1"] / jnp.sqrt(params["var1"] + eps)
    t1 = params["beta1"] - params["mean1"] * s1
    s2 = params["gamma2"] / jnp.sqrt(params["var2"] + eps)
    t2 = params["beta2"] - params["mean2"] * s2
    h = jnp.einsum("oi,bin->bon", params["w1"], feats)
    h = jnp.maximum(h * s1[None, :, None] + t1[None, :, None], 0.0)
    h = jnp.einsum("oi,bin->bon", params["w2"], h)
    h = jnp.maximum(h * s2[None, :, None] + t2[None, :, None], 0.0)

    B, _, N = points.shape
    C_out = h.shape[1]
    M = int(math.ceil(N / downsample_ratio))
    K = num_neighbors

    def fps_one(pts):  # (3, N)
        def body(i, carry):
            cur, dist, idxs = carry
            idxs = idxs.at[i].set(cur)
            d = jnp.sum((pts - pts[:, cur][:, None]) ** 2, axis=0)
            dist = jnp.minimum(dist, d)
            return jnp.argmax(dist).astype(jnp.int32), dist, idxs
        _, _, idxs = jax.lax.fori_loop(
            0, M, body,
            (jnp.int32(0), jnp.full((N,), 1e30, jnp.float32), jnp.zeros((M,), jnp.int32)))
        return idxs

    idxs = jax.vmap(fps_one)(points)                                   # (B, M)
    cent = jnp.take_along_axis(points, jnp.broadcast_to(idxs[:, None, :], (B, 3, M)), axis=2)
    d2 = jnp.sum((cent[:, :, :, None] - points[:, :, None, :]) ** 2, axis=1)   # (B, M, N)
    nn = jnp.argsort(d2, axis=-1)[:, :, :K]                            # (B, M, K)
    grouped = jnp.take_along_axis(
        h[:, :, None, :], jnp.broadcast_to(nn[:, None, :, :], (B, C_out, M, K)), axis=3)
    return grouped.mean(axis=3), cent


if __name__ == "__main__":
    B, C_in, C_out, N = 2, 4, 8, 16
    downsample_ratio, num_neighbors = 4, 4

    key = jax.random.PRNGKey(0)
    ks = jax.random.split(key, 8)
    feats = jax.random.normal(ks[0], (B, C_in, N), jnp.float32)
    points = jax.random.normal(ks[1], (B, 3, N), jnp.float32)

    params = {
        "w1": 0.5 * jax.random.normal(ks[2], (C_out, C_in), jnp.float32),
        "w2": 0.5 * jax.random.normal(ks[3], (C_out, C_out), jnp.float32),
        "gamma1": 1.0 + 0.1 * jax.random.normal(ks[4], (C_out,), jnp.float32),
        "beta1": 0.1 * jax.random.normal(ks[5], (C_out,), jnp.float32),
        "mean1": jnp.zeros((C_out,), jnp.float32),
        "var1": jnp.ones((C_out,), jnp.float32),
        "gamma2": 1.0 + 0.1 * jax.random.normal(ks[6], (C_out,), jnp.float32),
        "beta2": 0.1 * jax.random.normal(ks[7], (C_out,), jnp.float32),
        "mean2": jnp.zeros((C_out,), jnp.float32),
        "var2": jnp.ones((C_out,), jnp.float32),
    }

    feats_out, centroids = transition_down_block(
        feats, points, params, downsample_ratio, num_neighbors)
    jax.block_until_ready((feats_out, centroids))

    M = int(math.ceil(N / downsample_ratio))
    assert feats_out.shape == (B, C_out, M), feats_out.shape
    assert centroids.shape == (B, 3, M), centroids.shape
    assert bool(jnp.all(jnp.isfinite(feats_out)))
    assert bool(jnp.all(jnp.isfinite(centroids)))

    ref_feats, ref_cent = _reference(feats, points, params, downsample_ratio, num_neighbors)
    assert bool(jnp.allclose(centroids, ref_cent, atol=1e-6, rtol=1e-6)), "centroid mismatch"
    assert bool(jnp.allclose(feats_out.astype(jnp.float32), ref_feats, atol=5e-2, rtol=5e-2)), \
        "grouped feature mismatch"

    print("KERNEL_OK")
</pallas_src>

<mosaic_0001>
module attributes {stable_mosaic.version = 11 : i64} {
  func.func @_mlp_kernel(%arg0: i32, %arg1: i32, %arg2: memref<1x4x16xf32, #tpu.memory_space<vmem>>, %arg3: memref<8x4xf32, #tpu.memory_space<vmem>>, %arg4: memref<8x1xf32, #tpu.memory_space<vmem>>, %arg5: memref<8x1xf32, #tpu.memory_space<vmem>>, %arg6: memref<8x8xf32, #tpu.memory_space<vmem>>, %arg7: memref<8x1xf32, #tpu.memory_space<vmem>>, %arg8: memref<8x1xf32, #tpu.memory_space<vmem>>, %arg9: memref<1x8x16xbf16, #tpu.memory_space<vmem>>) attributes {dimension_semantics = [#tpu.dimension_semantics<parallel>, #tpu.dimension_semantics<parallel>], iteration_bounds = array<i64: 2, 1>, scalar_prefetch = 0 : i64, scratch_operands = 0 : i64, tpu.core_type = #tpu.core_type<tc>, window_params = [{transform_indices = @transform_0, window_bounds = array<i64: 1, 4, 16>}, {pipeline_mode = #tpu.pipeline_mode<synchronous>, transform_indices = @transform_1, window_bounds = array<i64: 8, 4>}, {pipeline_mode = #tpu.pipeline_mode<synchronous>, transform_indices = @transform_2, window_bounds = array<i64: 8, 1>}, {pipeline_mode = #tpu.pipeline_mode<synchronous>, transform_indices = @transform_3, window_bounds = array<i64: 8, 1>}, {pipeline_mode = #tpu.pipeline_mode<synchronous>, transform_indices = @transform_4, window_bounds = array<i64: 8, 8>}, {pipeline_mode = #tpu.pipeline_mode<synchronous>, transform_indices = @transform_5, window_bounds = array<i64: 8, 1>}, {pipeline_mode = #tpu.pipeline_mode<synchronous>, transform_indices = @transform_6, window_bounds = array<i64: 8, 1>}, {transform_indices = @transform_7, window_bounds = array<i64: 1, 8, 16>}]} {
    %c0 = arith.constant 0 : index
    %c0_0 = arith.constant 0 : index
    %c0_1 = arith.constant 0 : index
    %0 = vector.load %arg2[%c0, %c0_0, %c0_1] : memref<1x4x16xf32, #tpu.memory_space<vmem>>, vector<1x4x16xf32>
    %1 = vector.shape_cast %0 : vector<1x4x16xf32> to vector<4x16xf32>
    %c0_2 = arith.constant 0 : index
    %c0_3 = arith.constant 0 : index
    %2 = vector.load %arg3[%c0_2, %c0_3] : memref<8x4xf32, #tpu.memory_space<vmem>>, vector<8x4xf32>
    %cst = arith.constant dense<0.000000e+00> : vector<8x16xf32>
    %3 = tpu.matmul %2, %1, %cst {dimension_numbers = #tpu.dot_dimension_numbers<[1], [0], [0], [1], [0, 0, 1, 1], [], []>} : vector<8x4xf32>, vector<4x16xf32>, vector<8x16xf32> -> vector<8x16xf32>
    %c0_4 = arith.constant 0 : index
    %c0_5 = arith.constant 0 : index
    %4 = vector.load %arg4[%c0_4, %c0_5] : memref<8x1xf32, #tpu.memory_space<vmem>>, vector<8x1xf32>
    %5 = vector.broadcast %4 : vector<8x1xf32> to vector<8x16xf32>
    %6 = arith.mulf %3, %5 : vector<8x16xf32>
    %c0_6 = arith.constant 0 : index
    %c0_7 = arith.constant 0 : index
    %7 = vector.load %arg5[%c0_6, %c0_7] : memref<8x1xf32, #tpu.memory_space<vmem>>, vector<8x1xf32>
    %8 = vector.broadcast %7 : vector<8x1xf32> to vector<8x16xf32>
    %9 = arith.addf %6, %8 : vector<8x16xf32>
    %cst_8 = arith.constant 0.000000e+00 : f32
    %10 = vector.broadcast %cst_8 : f32 to vector<8x16xf32>
    %11 = arith.maximumf %9, %10 : vector<8x16xf32>
    %c0_9 = arith.constant 0 : index
    %c0_10 = arith.constant 0 : index
    %12 = vector.load %arg6[%c0_9, %c0_10] : memref<8x8xf32, #tpu.memory_space<vmem>>, vector<8x8xf32>
    %cst_11 = arith.constant dense<0.000000e+00> : vector<8x16xf32>
    %13 = tpu.matmul %12, %11, %cst_11 {dimension_numbers = #tpu.dot_dimension_numbers<[1], [0], [0], [1], [0, 0, 1, 1], [], []>} : vector<8x8xf32>, vector<8x16xf32>, vector<8x16xf32> -> vector<8x16xf32>
    %c0_12 = arith.constant 0 : index
    %c0_13 = arith.constant 0 : index
    %14 = vector.load %arg7[%c0_12, %c0_13] : memref<8x1xf32, #tpu.memory_space<vmem>>, vector<8x1xf32>
    %15 = vector.broadcast %14 : vector<8x1xf32> to vector<8x16xf32>
    %16 = arith.mulf %13, %15 : vector<8x16xf32>
    %c0_14 = arith.constant 0 : index
    %c0_15 = arith.constant 0 : index
    %17 = vector.load %arg8[%c0_14, %c0_15] : memref<8x1xf32, #tpu.memory_space<vmem>>, vector<8x1xf32>
    %18 = vector.broadcast %17 : vector<8x1xf32> to vector<8x16xf32>
    %19 = arith.addf %16, %18 : vector<8x16xf32>
    %cst_16 = arith.constant 0.000000e+00 : f32
    %20 = vector.broadcast %cst_16 : f32 to vector<8x16xf32>
    %21 = arith.maximumf %19, %20 : vector<8x16xf32>
    %22 = arith.truncf %21 : vector<8x16xf32> to vector<8x16xbf16>
    %c0_17 = arith.constant 0 : index
    %c0_18 = arith.constant 0 : index
    %c0_19 = arith.constant 0 : index
    %23 = vector.load %arg9[%c0_17, %c0_18, %c0_19] : memref<1x8x16xbf16, #tpu.memory_space<vmem>>, vector<1x8x16xbf16>
    %24 = vector.shape_cast %23 : vector<1x8x16xbf16> to vector<8x16xbf16>
    %25 = vector.shape_cast %22 : vector<8x16xbf16> to vector<1x8x16xbf16>
    tpu.vector_store %arg9[%c0_17, %c0_18, %c0_19], %25 {strides = array<i32>} : memref<1x8x16xbf16, #tpu.memory_space<vmem>>, vector<1x8x16xbf16>,
    return
  }
  func.func @transform_0(%arg0: i32, %arg1: i32) -> (i32, i32, i32) {
    %c0_i32 = arith.constant 0 : i32
    %c0_i32_0 = arith.constant 0 : i32
    return %arg0, %c0_i32, %arg1 : i32, i32, i32
  }
  func.func @transform_1(%arg0: i32, %arg1: i32) -> (i32, i32) {
    %c0_i32 = arith.constant 0 : i32
    %c0_i32_0 = arith.constant 0 : i32
    %c0_i32_1 = arith.constant 0 : i32
    return %c0_i32, %c0_i32_0 : i32, i32
  }
  func.func @transform_2(%arg0: i32, %arg1: i32) -> (i32, i32) {
    %c0_i32 = arith.constant 0 : i32
    %c0_i32_0 = arith.constant 0 : i32
    %c0_i32_1 = arith.constant 0 : i32
    return %c0_i32, %c0_i32_0 : i32, i32
  }
  func.func @transform_3(%arg0: i32, %arg1: i32) -> (i32, i32) {
    %c0_i32 = arith.constant 0 : i32
    %c0_i32_0 = arith.constant 0 : i32
    %c0_i32_1 = arith.constant 0 : i32
    return %c0_i32, %c0_i32_0 : i32, i32
  }
  func.func @transform_4(%arg0: i32, %arg1: i32) -> (i32, i32) {
    %c0_i32 = arith.constant 0 : i32
    %c0_i32_0 = arith.constant 0 : i32
    %c0_i32_1 = arith.constant 0 : i32
    return %c0_i32, %c0_i32_0 : i32, i32
  }
  func.func @transform_5(%arg0: i32, %arg1: i32) -> (i32, i32) {
    %c0_i32 = arith.constant 0 : i32
    %c0_i32_0 = arith.constant 0 : i32
    %c0_i32_1 = arith.constant 0 : i32
    return %c0_i32, %c0_i32_0 : i32, i32
  }
  func.func @transform_6(%arg0: i32, %arg1: i32) -> (i32, i32) {
    %c0_i32 = arith.constant 0 : i32
    %c0_i32_0 = arith.constant 0 : i32
    %c0_i32_1 = arith.constant 0 : i32
    return %c0_i32, %c0_i32_0 : i32, i32
  }
  func.func @transform_7(%arg0: i32, %arg1: i32) -> (i32, i32, i32) {
    %c0_i32 = arith.constant 0 : i32
    %c0_i32_0 = arith.constant 0 : i32
    return %arg0, %c0_i32, %arg1 : i32, i32, i32
  }
}

</mosaic_0001>

<bundles_post_ra>
// kernel: tpu_custom_call.1
= control target key start
LH: loop header
LB: loop body
LE: loop exit
PB: predicated region body
PF: predicated region fallthrough
CT: control target
= control target key end

     0   :  { %12 = vsyncpa [#allocation3], 0  ;;  %s900_s0 = inlined_call_operand.vmem [shape: f32[2,4,16], index: 0, kind: input, shape index: {}]   ;;  %s901_s1 = inlined_call_operand.vmem [shape: f32[8,4], index: 1, kind: input, shape index: {}]   ;;  %s902_s2 = inlined_call_operand.vmem [shape: f32[8,1], index: 2, kind: input, shape index: {}]   ;;  %s903_s3 = inlined_call_operand.vmem [shape: f32[8,1], index: 3, kind: input, shape index: {}]   ;;  %s904_s4 = inlined_call_operand.vmem [shape: f32[8,8], index: 4, kind: input, shape index: {}]   ;;  %s905_s5 = inlined_call_operand.vmem [shape: f32[8,1], index: 5, kind: input, shape index: {}]   ;;  %s906_s6 = inlined_call_operand.vmem [shape: f32[8,1], index: 6, kind: input, shape index: {}]   ;;  %s907_s7 = inlined_call_operand.hbm [shape: bf16[2,8,16], index: 7, kind: output, shape index: {}]  }
   0x1   :  { %14 = vsyncpa [#allocation3 + $0x1], 0  ;;  %s783_s24 = smov 0   ;;  %s785_s25 = smov 0  }
   0x2   :  { %s787_s26 = smov 0   ;;  %s789_s27 = smov 0  }
   0x3   :  { %s791_s28 = smov 0   ;;  %s793_s29 = smov 0  }
   0x4 LB: > { %s573_s30 = sadd.s32 4294967295, %s737_s29   ;;  %s574_s8 = sadd.s32 4294967294, %s737_s29   ;;  %s737_s29 = sphi %s793_s29, %s20_s29   ;;  %s733_s28 = sphi %s791_s28, %s914_s28   ;;  %s729_s27 = sphi %s789_s27, %s913_s27   ;;  %s725_s26 = sphi %s787_s26, %s912_s26   ;;  %s721_s25 = sphi %s785_s25, %s911_s25   ;;  %s717_s24 = sphi %s783_s24, %s910_s24  }
   0x5   : > { %s32_s9 = sadd.s32 1, %s733_s28  ;;  %s195_s10 = sadd.s32 1, %s725_s26 }
   0x6   : > { %p34_p0 = scmp.ge.s32.totalorder %s32_s9, 2  ;;  %p205_p1 = scmp.ne.s32.totalorder %s725_s26, %s721_s25 }
   0x7   : > { %p206_p2 = scmp.eq.s32.totalorder %s573_s30, 1  ;;  %p211_p3 = scmp.ne.s32.totalorder %s721_s25, %s717_s24 }
   0x8   : > { %s916_s9 = smov (%p34_p0, %s32_s9), 0  ;;  %p212_p5 = scmp.eq.s32.totalorder %s574_s8, 1 }
   0x9   : > { %p823_p4 = por %p206_p2, %p205_p1  ;;  %s190_s12 = ssub.s32 %s733_s28, %s916_s9 }
   0xa   : > { %p577_p6 = scmp.ge.s32.totalorder %s737_s29, 1  ;;  %p193_p7 = scmp.eq.s32.totalorder %s190_s12, 0 }
   0xb   : > { %p830_p8 = por %p212_p5, %p211_p3  ;;  %p258_p9 = scmp.lt.s32.totalorder %s737_s29, 3 }
   0xc   : > { %s836_s14 = scalar_select %p193_p7, %s725_s26, %s195_s10  }
   0xd   : > { %p259_p10 = pnand %p577_p6, %p258_p9 }
   0xe   : > { %p292_p11 = scmp.lt.s32.totalorder (!%p259_p10), %s729_s27, 1  ;;  %s289_s19 = sand.u32 (!%p259_p10), 1, %s721_s25  }
   0xf   : > { %262 = sbr.rel (%p259_p10) target bundleno = 440 (0x1b8), region = 48  ;;  %s578_s20 = sshll.u32 (!%p259_p10), %s289_s19, 2 }
  0x10   : > { %s584_s21 = sshll.u32 (!%p259_p10), %s729_s27, 6  ;;  %s291_s22 = scalar_lea.vmem (!%p259_p10), [#allocation2], %s578_s20 }
  0x11   : > { %s500_s10 = scalar_lea.hbm (!%p259_p10), %s907_s7, %s584_s21  ;;  %s488_s12 = scalar_lea.sflag (!%p259_p10), [#allocation3], %s289_s19 }
  0x12   : > { %s742_s16 = smov (!%p259_p10), [#allocation2]  }
  0x14   : > { %v739_v0 = vmov 0.0   ;;  %vm740_vm0 = vmmov 0   ;;  %v379_v1 = vld [vmem:[%s902_s2] sm:$0xff]  ;;  %s293_s17 = scalar_select %p292_p11, %s729_s27, 1  ;;  %v741_v2 = vmov 0   ;;  %vm305_vm1 = vcmask 1043456  }
  0x15   : > { %591 = vmatprep.subr.mxu0 %v739_v0  ;;  %593 = vmatprep.mubr.msk.f32.mxu0 %vm740_vm0, %v739_v0  ;;  %v386_v3 = vld [vmem:[%s903_s3] sm:$0xff]  ;;  %vm301_vm2 = vcmask 31744   ;;  %vm395_vm3 = vcmask 64512   ;;  %vm485_vm4 = vcmask 125952  }
  0x16   : > { %659 = vset.pattern.permute.xlu0 %v741_v2  ;;  %596 = vmatprep.subr.mxu1 %v739_v0  ;;  %s579_s18 = sshll.u32 %s293_s17, 2  ;;  %v300_v4 = vld [vmem:[%s901_s1] sm:$0xff]  ;;  %s665_s17 = sshll.u32 %s742_s16, 4  ;;  %s666_s17 = int_to_ptr.vmem [resolvable:$false] %s665_s17 }
  0x17   : > { %382 = vperm.xlu0 %659, %v379_v1   ;;  %598 = vmatprep.mubr.msk.f32.mxu1 %vm740_vm0, %v739_v0  ;;  %s298_s23 = scalar_lea.vmem %s900_s0, %s579_s18  ;;  %v469_v6 = vld [vmem:[%s905_s5] sm:$0xff]  ;;  %s667_s27 = scalar_lea.vmem %s666_s17, 128 }
  0x18   : > { %660 = vset.pattern.permute.xlu1 %v741_v2  ;;  %v299_v5 = vld [vmem:[%s298_s23] sm:$0xf]  ;;  %s502_s23 = sshll.u32 %s291_s22, 4  ;;  %s503_s23 = int_to_ptr.vmem [resolvable:$true] %s502_s23 }
  0x19   : > { %592 = vmatpush3.msk.msra.mxu0 %vm305_vm1, %v299_v5  ;;  %472 = vperm.xlu1 %660, %v469_v6   ;;  %v476_v7 = vld [vmem:[%s906_s6] sm:$0xff]  ;;  %s661_s15 = scalar_lea.vmem %s503_s23, 64  ;;  %p668_p1 = scmp.lt.s32.totalorder %s503_s23, %s666_s17 }
  0x1a   : > { %594 = vmatmul.mubr.msk.f32.vlgmr.msra.gmra.mxu0 %vm301_vm2, %v300_v4  ;;  %v394_v15 = vld [vmem:[%s904_s4] sm:$0xff]  ;;  %p662_p12 = scmp.ne.s32.totalorder %s503_s23, %s661_s15  ;;  %p669_p2 = scmp.lt.s32.totalorder %s667_s27, %s661_s15 }
  0x1b   : > { %389 = vperm.xlu0 %659, %v386_v3  }
  0x1c   : > { %p663_p13 = pnand %p662_p12, %p823_p4  ;;  %p670_p3 = por %p669_p2, %p668_p1 }
  0x1d   : > { %479 = vperm.xlu1 %660, %v476_v7  }
  0x1e   : > { %p664_p0 = pneg %p663_p13 }
  0x20   : > { %p671_p5 = pnand %p670_p3, %p664_p0 }
  0x92   : > { %v383_v8 = vpop.permute.xlu0 %382 }
  0x94   : > { %v473_v16 = vpop.permute.xlu1 %472 }
  0x96   : > { %v390_v11 = vpop.permute.xlu0 %389 }
  0x98   : > { %v480_v19 = vpop.permute.xlu1 %479 }
  0xda   : > { %v375_v9 = vpop.f32.mrf.mxu0 }
  0xdb   : > { %v385_v10 = vmul.f32 %v383_v8, %v375_v9 }
  0xdc   : > { %v595_v12 = vpop.f32.mrf.mxu0 }
  0xdd   : > { %v392_v13 = vadd.f32 %v390_v11, %v385_v10 }
  0xdf   : > { %v393_v14 = vmax.f32 %v392_v13, 0.0 }
  0xe1   : > { %597 = vmatpush3.msra.mxu1 %v393_v14 }
  0xe2   : > { %599 = vmatmul.mubr.msk.f32.vlgmr.msra.gmra.mxu1 %vm395_vm3, %v394_v15 }
 0x1a2   : > { %v465_v17 = vpop.f32.mrf.mxu1 }
 0x1a3   : > { %v475_v18 = vmul.f32 %v473_v16, %v465_v17 }
 0x1a4   : > { %v600_v20 = vpop.f32.mrf.mxu1 }
 0x1a5   : > { %v482_v21 = vadd.f32 %v480_v19, %v475_v18 }
 0x1a7   : > { %v483_v22 = vmax.f32 %v482_v21, 0.0 }
 0x1a9   : > { %v484_v23 = vpack.c.bf16 %v483_v22, %v483_v22 }
 0x1ab   : > { %486 = vst.msk [vmem:[%s291_s22] sm:$0xf] %vm485_vm4, %v484_v23 }
 0x1ac   : > { %674 = shalt.err (!%p671_p5)
}
 0x1ad   : > { %s675_s18 = scalar_lea.hbm %s500_s10, 64  ;;  %s679_s21 = scalar_lea.hbm %s907_s7, 128 }
 0x1ae   : > { %p676_p6 = scmp.ne.s32.totalorder %s500_s10, %s675_s18  ;;  %p680_p10 = scmp.lt.s32.totalorder %s500_s10, %s907_s7 }
 0x1af   : > { %p681_p11 = scmp.lt.s32.totalorder %s679_s21, %s675_s18 }
 0x1b0   : > { %p677_p7 = pnand %p676_p6, %p823_p4 }
 0x1b1   : > { %p682_p12 = por %p681_p11, %p680_p10 }
 0x1b2   : > { %p678_p9 = pneg %p677_p7 }
 0x1b4   : > { %p683_p13 = pnand %p682_p12, %p678_p9 }
 0x1b6   : > { %686 = shalt.err (!%p683_p13)
}
 0x1b7   : > { %601 = dma.vmem_to_hbm [thread:$0]  (%p823_p4), %s503_s23, 64, %s500_s10, %s488_s12  }
 0x1b8 PF: > { %p607_p0 = scmp.ge.s32.totalorder %s737_s29, 2  ;;  %s514_s8 = sand.u32 1, %s717_s24  }
 0x1b9   : > { %s515_s15 = scalar_lea.sflag [#allocation3], %s514_s8 }
 0x1ba   : > { %p604_p1 = pnand %p607_p0, %p830_p8 }
 0x1bc   : > { %p605_p2 = pneg %p604_p1 }
 0x1be   : > { %712 = dma.done.wait (%p605_p2), %s515_s15, 64  }
 0x1bf   : > { %714 = vsyncadd (%p605_p2), %s515_s15, 4294967232  ;;  %s20_s29 = sadd.s32 1, %s737_s29   ;;  %s910_s24 = smov %s721_s25 }
 0x1c0   : > { %p17_p3 = scmp.ge.s32.totalorder %s20_s29, 4   ;;  %s911_s25 = smov %s725_s26 }
 0x1c1   : > { %s912_s26 = smov %s836_s14  ;;  %s913_s27 = smov %s733_s28 }
 0x1c2   : > { %s914_s28 = smov %s916_s9  ;;  %19 = sbr.rel (!%p17_p3) target bundleno = 4 (0x4), region = 83 }
 0x1c7   :  { %520 = vsyncpa [#allocation3], 1 }
 0x1c8   :  { %522 = vsyncpa [#allocation3 + $0x1], 1 }

</bundles_post_ra>
